<compile_context>
chip_gen: v6e
topology: v6e:2x2x1
jax: 0.10.0
libtpu: 0.0.40
codegen_flags: <defaults>
</compile_context>

<pallas_src>
import jax
import jax.numpy as jnp
from jax.experimental import pallas as pl
from jax.experimental.pallas import tpu as pltpu

LANE = 128          # lane width (last-dim granularity)
SUBLANE_BF16 = 16   # bf16 packs 2 rows/sublane -> native (16, 128) tile


def _round_up(v, m):
    return (v + m - 1) // m * m


def _pad2d(x, rows, cols):
    r, c = x.shape
    return jnp.pad(x, ((0, rows - r), (0, cols - c)))


def _make_fused_sagenet_kernel(num_layers, nt_pads, cout_final):
    """Build the fused kernel body (all shapes / layer count are static)."""

    def kernel(*refs):
        # refs layout: [x0] + [a_i, w_fused_i, b_i]*L + [out] + [h_i]*(L-1)
        x0_ref = refs[0]
        layer_refs = refs[1:1 + 3 * num_layers]
        o_ref = refs[1 + 3 * num_layers]
        h_refs = refs[2 + 3 * num_layers:]

        src_ref = x0_ref   # current bf16 source-feature ref (VMEM resident)
        for i in range(num_layers):
            a_ref, w_ref, b_ref = layer_refs[3 * i:3 * (i + 1)]
            last = i == num_layers - 1

            # mean aggregation: A is pre-normalized (row / max(deg,1)) in the
            # wrapper, so this single bf16 MXU product IS the mean aggregate.
            agg = jnp.dot(a_ref[...], src_ref[...],
                          preferred_element_type=jnp.float32)  # f32 [NtP,CinP]

            # K-concat fusion of lin_l and lin_r into one MXU matmul:
            #   [agg | x_target] @ [[W_l], [W_r]]  (+ bias)
            # Targets are the (tile-aligned, 16-row padded) prefix of sources.
            xt = src_ref[0:nt_pads[i], :]                       # bf16 [NtP,CinP]
            lhs = jnp.concatenate([agg.astype(jnp.bfloat16), xt], axis=-1)
            out = jnp.dot(lhs, w_ref[...],
                          preferred_element_type=jnp.float32) + b_ref[...]

            if not last:
                # ReLU in f32, store activation as bf16 (next layer's MXU
                # input dtype) -> halves scratch VMEM + hand-off bytes.
                # TODO(synk): dropout(p=0.5) identity (inference semantics).
                h_refs[i][...] = jnp.maximum(out, 0.0).astype(jnp.bfloat16)
                src_ref = h_refs[i]
            else:
                # masked log_softmax over the real output channels only
                lane = jax.lax.broadcasted_iota(jnp.int32, out.shape, 1)
                z = jnp.where(lane < cout_final, out, -1e30)
                mx = jnp.max(z, axis=-1, keepdims=True)
                s = z - mx
                lse = jnp.log(jnp.sum(jnp.exp(s), axis=-1, keepdims=True))
                o_ref[...] = (s - lse).astype(o_ref.dtype)

    return kernel


def sagenet_forward(x, adjs, params):
    """Mirrors SAGENet.forward (inference semantics) as one fused Pallas call.

    x      : [N0, in_channels] f32 node features of the sampled node set.
    adjs   : list of (adj_dense [Nt, Ns] f32, size=(Ns, Nt)) per hop.
    params : list of (w_l [Cin,Cout], b_l [Cout], w_r [Cin,Cout]) per layer.
    """
    num_layers = len(params)
    n0, cin0 = x.shape
    nts = [sz[1] for (_, sz) in adjs]
    nss = [sz[0] for (_, sz) in adjs]

    # channel chain [in, hidden, ..., out]
    dims = [params[0][0].shape[0]] + [w_l.shape[1] for (w_l, _, _) in params]
    assert dims[0] == cin0
    # NeighborSampler convention: targets are a prefix of the source node set.
    assert nss[0] == n0
    for i in range(1, num_layers):
        assert nss[i] == nts[i - 1]

    dim_pads = [_round_up(d, LANE) for d in dims]          # lane-dense channels
    n0_pad = _round_up(n0, SUBLANE_BF16)                   # bf16 16-row tiles
    nt_pads = [_round_up(nt, SUBLANE_BF16) for nt in nts]
    ns_pads = [n0_pad] + nt_pads[:-1]
    for i in range(num_layers):
        # target-prefix slice must stay inside the padded source rows
        assert nt_pads[i] <= ns_pads[i]

    ops = [_pad2d(x.astype(jnp.bfloat16), n0_pad, dim_pads[0])]
    for i in range(num_layers):
        adj, _ = adjs[i]
        w_l, b_l, w_r = params[i]
        cin, cout = dims[i], dims[i + 1]
        cin_p, cout_p = dim_pads[i], dim_pads[i + 1]

        # Degree normalization folded into the (padded, bf16) adjacency in the
        # wrapper: no in-kernel XLU reduce, and the exact same precision path
        # as the reference (bf16 normalized A).
        deg = jnp.sum(adj, axis=1, keepdims=True)
        a_norm = adj / jnp.maximum(deg, 1.0)
        ops.append(_pad2d(a_norm.astype(jnp.bfloat16), nt_pads[i], ns_pads[i]))

        # Fused weight [2*CinP, CoutP]: rows [0:Cin] = W_l (multiplies the
        # aggregate half of the LHS), rows [CinP:CinP+Cin] = W_r (multiplies
        # the x_target half); everything else zero.
        w_fused = jnp.zeros((2 * cin_p, cout_p), jnp.bfloat16)
        w_fused = w_fused.at[:cin, :cout].set(w_l.astype(jnp.bfloat16))
        w_fused = w_fused.at[cin_p:cin_p + cin, :cout].set(
            w_r.astype(jnp.bfloat16))
        ops.append(w_fused)

        # bias stays f32 for the f32 epilogue
        ops.append(_pad2d(b_l.astype(jnp.float32).reshape(1, -1), 1, cout_p))

    kernel = _make_fused_sagenet_kernel(
        num_layers=num_layers,
        nt_pads=tuple(nt_pads),
        cout_final=dims[-1],
    )

    # grid=() -> every operand is a single full-array VMEM block.
    full = lambda shape: pl.BlockSpec(shape, lambda: (0,) * len(shape))
    out_pad = pl.pallas_call(
        kernel,
        out_shape=jax.ShapeDtypeStruct((nt_pads[-1], dim_pads[-1]), jnp.float32),
        grid=(),
        in_specs=[full(op.shape) for op in ops],
        out_specs=full((nt_pads[-1], dim_pads[-1])),
        # bf16 inter-layer activation scratch (next layer needs bf16 anyway)
        scratch_shapes=[pltpu.VMEM((nt_pads[i], dim_pads[i + 1]), jnp.bfloat16)
                        for i in range(num_layers - 1)],
        # Comfortably inside v7x's 64 MiB physical VMEM at these demo sizes;
        # see TODO(synk) above for per-generation budgets of the tiled version.
        compiler_params=pltpu.CompilerParams(vmem_limit_bytes=32 * 1024 * 1024),
    )(*ops)
    return out_pad[:nts[-1], :dims[-1]]


def make_sage_params(key, in_channels, hidden_channels, out_channels, num_layers):
    """Deterministic parameter init mirroring SAGENet.__init__ layer shapes."""
    dims = [in_channels] + [hidden_channels] * (num_layers - 1) + [out_channels]
    params = []
    for i in range(num_layers):
        cin, cout = dims[i], dims[i + 1]
        key, k1, k2 = jax.random.split(key, 3)
        scale = 1.0 / jnp.sqrt(jnp.float32(cin))
        w_l = jax.random.uniform(k1, (cin, cout), jnp.float32, -scale, scale)
        w_r = jax.random.uniform(k2, (cin, cout), jnp.float32, -scale, scale)
        b_l = jnp.zeros((cout,), jnp.float32)
        params.append((w_l, b_l, w_r))
    return params


def sagenet_reference(x, adjs, params):
    """Pure-JAX reference (same bf16-in / f32-accumulate precision)."""
    h = x
    num_layers = len(params)
    for i, ((adj, (ns, nt)), (w_l, b_l, w_r)) in enumerate(zip(adjs, params)):
        deg = jnp.sum(adj, axis=1, keepdims=True)
        a_norm = adj / jnp.maximum(deg, 1.0)
        h_tgt = h[:nt]
        agg = jnp.dot(a_norm.astype(jnp.bfloat16), h.astype(jnp.bfloat16),
                      preferred_element_type=jnp.float32)
        out = jnp.dot(agg.astype(jnp.bfloat16), w_l.astype(jnp.bfloat16),
                      preferred_element_type=jnp.float32) + b_l
        out = out + jnp.dot(h_tgt.astype(jnp.bfloat16), w_r.astype(jnp.bfloat16),
                            preferred_element_type=jnp.float32)
        if i != num_layers - 1:
            h = jnp.maximum(out, 0.0)
        else:
            h = jax.nn.log_softmax(out, axis=-1)
    return h


if __name__ == "__main__":
    key = jax.random.PRNGKey(0)

    # Small synthetic configuration consistent with the module's forward:
    in_channels, hidden_channels, out_channels = 16, 32, 8
    num_layers = 3
    # Node counts per sampled hop (sources shrink toward the final targets).
    node_counts = [32, 20, 12, 8]   # N0 -> N1 -> N2 -> N3

    key, kx = jax.random.split(key)
    x = jax.random.normal(kx, (node_counts[0], in_channels), jnp.float32)

    adjs = []
    for i in range(num_layers):
        ns, nt = node_counts[i], node_counts[i + 1]
        key, ka = jax.random.split(key)
        adj = jax.random.bernoulli(ka, p=0.3, shape=(nt, ns)).astype(jnp.float32)
        # every target has at least one neighbor (its own "self" column)
        adj = adj.at[:, :nt].set(jnp.maximum(adj[:, :nt],
                                             jnp.eye(nt, dtype=jnp.float32)))
        adjs.append((adj, (ns, nt)))

    params = make_sage_params(key, in_channels, hidden_channels, out_channels,
                              num_layers)

    out = sagenet_forward(x, adjs, params)
    out = jax.block_until_ready(out)

    # correctness vs. pure-JAX reference (matched bf16/f32 precision)
    ref = sagenet_reference(x, adjs, params)
    max_err = float(jnp.max(jnp.abs(out - ref)))
    assert out.shape == (node_counts[-1], out_channels), out.shape
    assert max_err < 5e-2, f"max abs error vs reference: {max_err}"

    # sanity: exp(log_softmax) rows should sum to ~1
    row_sums = jnp.exp(out).sum(axis=-1)
    assert bool(jnp.all(jnp.abs(row_sums - 1.0) < 1e-3))

    print("KERNEL_OK")
</pallas_src>

<mosaic_0001>
module attributes {stable_mosaic.version = 11 : i64} {
  func.func @kernel(%arg0: memref<32x128xbf16, #tpu.memory_space<vmem>>, %arg1: memref<32x32xbf16, #tpu.memory_space<vmem>>, %arg2: memref<256x128xbf16, #tpu.memory_space<vmem>>, %arg3: memref<1x128xf32, #tpu.memory_space<vmem>>, %arg4: memref<16x32xbf16, #tpu.memory_space<vmem>>, %arg5: memref<256x128xbf16, #tpu.memory_space<vmem>>, %arg6: memref<1x128xf32, #tpu.memory_space<vmem>>, %arg7: memref<16x16xbf16, #tpu.memory_space<vmem>>, %arg8: memref<256x128xbf16, #tpu.memory_space<vmem>>, %arg9: memref<1x128xf32, #tpu.memory_space<vmem>>, %arg10: memref<16x128xf32, #tpu.memory_space<vmem>>, %arg11: memref<32x128xbf16, #tpu.memory_space<vmem>>, %arg12: memref<16x128xbf16, #tpu.memory_space<vmem>>) attributes {dimension_semantics = [], scalar_prefetch = 0 : i64, scratch_operands = 2 : i64, tpu.core_type = #tpu.core_type<tc>} {
    %c0 = arith.constant 0 : index
    %c0_0 = arith.constant 0 : index
    %0 = vector.load %arg1[%c0, %c0_0] : memref<32x32xbf16, #tpu.memory_space<vmem>>, vector<32x32xbf16>
    %c0_1 = arith.constant 0 : index
    %c0_2 = arith.constant 0 : index
    %1 = vector.load %arg0[%c0_1, %c0_2] : memref<32x128xbf16, #tpu.memory_space<vmem>>, vector<32x128xbf16>
    %cst = arith.constant dense<0.000000e+00> : vector<32x128xf32>
    %2 = tpu.matmul %0, %1, %cst {dimension_numbers = #tpu.dot_dimension_numbers<[1], [0], [0], [1], [0, 0, 1, 1], [], []>} : vector<32x32xbf16>, vector<32x128xbf16>, vector<32x128xf32> -> vector<32x128xf32>
    %c0_3 = arith.constant 0 : index
    %c0_4 = arith.constant 0 : index
    %3 = vector.load %arg0[%c0_3, %c0_4] : memref<32x128xbf16, #tpu.memory_space<vmem>>, vector<32x128xbf16>
    %4 = arith.truncf %2 : vector<32x128xf32> to vector<32x128xbf16>
    %5 = tpu.concatenate %4, %3 in 1 : vector<32x128xbf16>, vector<32x128xbf16> -> vector<32x256xbf16>
    %c0_5 = arith.constant 0 : index
    %c0_6 = arith.constant 0 : index
    %6 = vector.load %arg2[%c0_5, %c0_6] : memref<256x128xbf16, #tpu.memory_space<vmem>>, vector<256x128xbf16>
    %cst_7 = arith.constant dense<0.000000e+00> : vector<32x128xf32>
    %7 = tpu.matmul %5, %6, %cst_7 {dimension_numbers = #tpu.dot_dimension_numbers<[1], [0], [0], [1], [0, 0, 1, 1], [], []>} : vector<32x256xbf16>, vector<256x128xbf16>, vector<32x128xf32> -> vector<32x128xf32>
    %c0_8 = arith.constant 0 : index
    %c0_9 = arith.constant 0 : index
    %8 = vector.load %arg3[%c0_8, %c0_9] : memref<1x128xf32, #tpu.memory_space<vmem>>, vector<1x128xf32>
    %9 = vector.broadcast %8 : vector<1x128xf32> to vector<32x128xf32>
    %10 = arith.addf %7, %9 : vector<32x128xf32>
    %cst_10 = arith.constant 0.000000e+00 : f32
    %11 = vector.broadcast %cst_10 : f32 to vector<32x128xf32>
    %12 = arith.maximumf %10, %11 : vector<32x128xf32>
    %13 = arith.truncf %12 : vector<32x128xf32> to vector<32x128xbf16>
    %c0_11 = arith.constant 0 : index
    %c0_12 = arith.constant 0 : index
    %14 = vector.load %arg11[%c0_11, %c0_12] : memref<32x128xbf16, #tpu.memory_space<vmem>>, vector<32x128xbf16>
    tpu.vector_store %arg11[%c0_11, %c0_12], %13 {strides = array<i32>} : memref<32x128xbf16, #tpu.memory_space<vmem>>, vector<32x128xbf16>,
    %c0_13 = arith.constant 0 : index
    %c0_14 = arith.constant 0 : index
    %15 = vector.load %arg4[%c0_13, %c0_14] : memref<16x32xbf16, #tpu.memory_space<vmem>>, vector<16x32xbf16>
    %c0_15 = arith.constant 0 : index
    %c0_16 = arith.constant 0 : index
    %16 = vector.load %arg11[%c0_15, %c0_16] : memref<32x128xbf16, #tpu.memory_space<vmem>>, vector<32x128xbf16>
    %cst_17 = arith.constant dense<0.000000e+00> : vector<16x128xf32>
    %17 = tpu.matmul %15, %16, %cst_17 {dimension_numbers = #tpu.dot_dimension_numbers<[1], [0], [0], [1], [0, 0, 1, 1], [], []>} : vector<16x32xbf16>, vector<32x128xbf16>, vector<16x128xf32> -> vector<16x128xf32>
    %c0_18 = arith.constant 0 : index
    %c0_19 = arith.constant 0 : index
    %18 = vector.load %arg11[%c0_18, %c0_19] : memref<32x128xbf16, #tpu.memory_space<vmem>>, vector<16x128xbf16>
    %19 = arith.truncf %17 : vector<16x128xf32> to vector<16x128xbf16>
    %20 = tpu.concatenate %19, %18 in 1 : vector<16x128xbf16>, vector<16x128xbf16> -> vector<16x256xbf16>
    %c0_20 = arith.constant 0 : index
    %c0_21 = arith.constant 0 : index
    %21 = vector.load %arg5[%c0_20, %c0_21] : memref<256x128xbf16, #tpu.memory_space<vmem>>, vector<256x128xbf16>
    %cst_22 = arith.constant dense<0.000000e+00> : vector<16x128xf32>
    %22 = tpu.matmul %20, %21, %cst_22 {dimension_numbers = #tpu.dot_dimension_numbers<[1], [0], [0], [1], [0, 0, 1, 1], [], []>} : vector<16x256xbf16>, vector<256x128xbf16>, vector<16x128xf32> -> vector<16x128xf32>
    %c0_23 = arith.constant 0 : index
    %c0_24 = arith.constant 0 : index
    %23 = vector.load %arg6[%c0_23, %c0_24] : memref<1x128xf32, #tpu.memory_space<vmem>>, vector<1x128xf32>
    %24 = vector.broadcast %23 : vector<1x128xf32> to vector<16x128xf32>
    %25 = arith.addf %22, %24 : vector<16x128xf32>
    %cst_25 = arith.constant 0.000000e+00 : f32
    %26 = vector.broadcast %cst_25 : f32 to vector<16x128xf32>
    %27 = arith.maximumf %25, %26 : vector<16x128xf32>
    %28 = arith.truncf %27 : vector<16x128xf32> to vector<16x128xbf16>
    %c0_26 = arith.constant 0 : index
    %c0_27 = arith.constant 0 : index
    %29 = vector.load %arg12[%c0_26, %c0_27] : memref<16x128xbf16, #tpu.memory_space<vmem>>, vector<16x128xbf16>
    tpu.vector_store %arg12[%c0_26, %c0_27], %28 {strides = array<i32>} : memref<16x128xbf16, #tpu.memory_space<vmem>>, vector<16x128xbf16>,
    %c0_28 = arith.constant 0 : index
    %c0_29 = arith.constant 0 : index
    %30 = vector.load %arg7[%c0_28, %c0_29] : memref<16x16xbf16, #tpu.memory_space<vmem>>, vector<16x16xbf16>
    %c0_30 = arith.constant 0 : index
    %c0_31 = arith.constant 0 : index
    %31 = vector.load %arg12[%c0_30, %c0_31] : memref<16x128xbf16, #tpu.memory_space<vmem>>, vector<16x128xbf16>
    %cst_32 = arith.constant dense<0.000000e+00> : vector<16x128xf32>
    %32 = tpu.matmul %30, %31, %cst_32 {dimension_numbers = #tpu.dot_dimension_numbers<[1], [0], [0], [1], [0, 0, 1, 1], [], []>} : vector<16x16xbf16>, vector<16x128xbf16>, vector<16x128xf32> -> vector<16x128xf32>
    %c0_33 = arith.constant 0 : index
    %c0_34 = arith.constant 0 : index
    %33 = vector.load %arg12[%c0_33, %c0_34] : memref<16x128xbf16, #tpu.memory_space<vmem>>, vector<16x128xbf16>
    %34 = arith.truncf %32 : vector<16x128xf32> to vector<16x128xbf16>
    %35 = tpu.concatenate %34, %33 in 1 : vector<16x128xbf16>, vector<16x128xbf16> -> vector<16x256xbf16>
    %c0_35 = arith.constant 0 : index
    %c0_36 = arith.constant 0 : index
    %36 = vector.load %arg8[%c0_35, %c0_36] : memref<256x128xbf16, #tpu.memory_space<vmem>>, vector<256x128xbf16>
    %cst_37 = arith.constant dense<0.000000e+00> : vector<16x128xf32>
    %37 = tpu.matmul %35, %36, %cst_37 {dimension_numbers = #tpu.dot_dimension_numbers<[1], [0], [0], [1], [0, 0, 1, 1], [], []>} : vector<16x256xbf16>, vector<256x128xbf16>, vector<16x128xf32> -> vector<16x128xf32>
    %c0_38 = arith.constant 0 : index
    %c0_39 = arith.constant 0 : index
    %38 = vector.load %arg9[%c0_38, %c0_39] : memref<1x128xf32, #tpu.memory_space<vmem>>, vector<1x128xf32>
    %39 = vector.broadcast %38 : vector<1x128xf32> to vector<16x128xf32>
    %40 = arith.addf %37, %39 : vector<16x128xf32>
    %41 = tpu.iota {dimensions = array<i32: 1>} : vector<16x128xi32>
    %c8_i32 = arith.constant 8 : i32
    %42 = vector.broadcast %c8_i32 : i32 to vector<16x128xi32>
    %43 = arith.cmpi slt, %41, %42 : vector<16x128xi32>
    %cst_40 = arith.constant -1.000000e+30 : f32
    %44 = vector.broadcast %cst_40 : f32 to vector<16x128xf32>
    %45 = arith.select %43, %40, %44 : vector<16x128xi1>, vector<16x128xf32>
    %cst_41 = arith.constant dense<0xFF800000> : vector<16xf32>
    %46 = vector.multi_reduction <maximumf>, %45, %cst_41 [1] : vector<16x128xf32> to vector<16xf32>
    %47 = vector.shape_cast %46 : vector<16xf32> to vector<16x1xf32>
    %48 = vector.broadcast %47 : vector<16x1xf32> to vector<16x128xf32>
    %49 = arith.subf %45, %48 : vector<16x128xf32>
    %50 = math.exp %49 : vector<16x128xf32>
    %cst_42 = arith.constant dense<0.000000e+00> : vector<16xf32>
    %51 = vector.multi_reduction <add>, %50, %cst_42 [1] : vector<16x128xf32> to vector<16xf32>
    %52 = vector.shape_cast %51 : vector<16xf32> to vector<16x1xf32>
    %53 = math.log %52 : vector<16x1xf32>
    %54 = vector.broadcast %53 : vector<16x1xf32> to vector<16x128xf32>
    %55 = arith.subf %49, %54 : vector<16x128xf32>
    %c0_43 = arith.constant 0 : index
    %c0_44 = arith.constant 0 : index
    %56 = vector.load %arg10[%c0_43, %c0_44] : memref<16x128xf32, #tpu.memory_space<vmem>>, vector<16x128xf32>
    tpu.vector_store %arg10[%c0_43, %c0_44], %55 {strides = array<i32>} : memref<16x128xf32, #tpu.memory_space<vmem>>, vector<16x128xf32>,
    return
  }
}

</mosaic_0001>

<bundles_post_ra>
// kernel: tpu_custom_call.1
= control target key start
LH: loop header
LB: loop body
LE: loop exit
PB: predicated region body
PF: predicated region fallthrough
CT: control target
= control target key end

     0   :  { %15 = vsyncpa [#allocation5], 0  ;;  %s1517_s0 = inlined_call_operand.hbm [shape: bf16[32,128], index: 0, kind: input, shape index: {}]   ;;  %s1518_s1 = inlined_call_operand.hbm [shape: bf16[32,32], index: 1, kind: input, shape index: {}]   ;;  %s1519_s2 = inlined_call_operand.hbm [shape: bf16[256,128], index: 2, kind: input, shape index: {}]   ;;  %s1520_s3 = inlined_call_operand.vmem [shape: f32[1,128], index: 3, kind: input, shape index: {}]   ;;  %s1521_s4 = inlined_call_operand.hbm [shape: bf16[16,32], index: 4, kind: input, shape index: {}]   ;;  %s1522_s5 = inlined_call_operand.hbm [shape: bf16[256,128], index: 5, kind: input, shape index: {}]   ;;  %s1523_s6 = inlined_call_operand.vmem [shape: f32[1,128], index: 6, kind: input, shape index: {}]   ;;  %s1524_s7 = inlined_call_operand.vmem [shape: bf16[16,16], index: 7, kind: input, shape index: {}]   ;;  %s1525_s8 = inlined_call_operand.hbm [shape: bf16[256,128], index: 8, kind: input, shape index: {}]   ;;  %s1526_s9 = inlined_call_operand.vmem [shape: f32[1,128], index: 9, kind: input, shape index: {}]   ;;  %s1527_s10 = inlined_call_operand.hbm [shape: f32[16,128], index: 10, kind: output, shape index: {}]  }
   0x1   :  { %16 = vsyncpa [#allocation8], 0 }
   0x2   :  { %17 = vsyncpa [#allocation11], 0 }
   0x3   :  { %18 = vsyncpa [#allocation14], 0 }
   0x4   :  { %19 = vsyncpa [#allocation6], 0  ;;  %s1388_s13 = smov [#allocation7]   ;;  %s1389_s15 = smov [#allocation10]  }
   0x5   :  { %s37_s14 = sshll.u32 %s1388_s13, 4  ;;  %s63_s16 = sshll.u32 %s1389_s15, 4  ;;  %s38_s14 = int_to_ptr.vmem [resolvable:$true] %s37_s14  ;;  %s64_s16 = int_to_ptr.vmem [resolvable:$true] %s63_s16 }
   0x6   :  { %s1246_s17 = scalar_lea.vmem %s38_s14, 256  ;;  %p1251_p1 = scmp.lt.s32.totalorder %s38_s14, %s38_s14 }
   0x7   :  { %p1247_p0 = scmp.ne.s32.totalorder %s38_s14, %s1246_s17  ;;  %p1252_p2 = scmp.lt.s32.totalorder %s1246_s17, %s1246_s17 }
   0x9   :  { %p1253_p3 = por %p1252_p2, %p1251_p1 }
   0xb   :  { %p1254_p4 = pnand %p1253_p3, %p1247_p0 }
   0xd   :  { %1257 = shalt.err (!%p1254_p4)
}
   0xe   :  { %s1390_s18 = smov 64   ;;  %s1391_s19 = smov 4  }
   0xf   :  { %43 = dma.hbm_to_vmem [thread:$0]  %s1518_s1, 256, %s38_s14, [#allocation8], %s1390_s18, %s1390_s18, %s1391_s19  }
  0x10   :  { %s1266_s22 = scalar_lea.vmem %s64_s16, 128  ;;  %p1271_p6 = scmp.lt.s32.totalorder %s64_s16, %s64_s16 }
  0x11   :  { %p1267_p5 = scmp.ne.s32.totalorder %s64_s16, %s1266_s22  ;;  %p1272_p7 = scmp.lt.s32.totalorder %s1266_s22, %s1266_s22 }
  0x13   :  { %p1273_p8 = por %p1272_p7, %p1271_p6 }
  0x15   :  { %p1274_p9 = pnand %p1273_p8, %p1267_p5 }
  0x17   :  { %1277 = shalt.err (!%p1274_p9)
}
  0x18   :  { %69 = dma.hbm_to_vmem [thread:$0]  %s1521_s4, 128, %s64_s16, [#allocation11], %s1390_s18, %s1390_s18, %s1391_s19  }
  0x19   :  { %s1392_s25 = smov [#allocation4]   ;;  %s1393_s27 = smov [#allocation9]  }
  0x1a   :  { %s25_s26 = sshll.u32 %s1392_s25, 4  ;;  %s49_s28 = sshll.u32 %s1393_s27, 4  ;;  %s26_s26 = int_to_ptr.vmem [resolvable:$true] %s25_s26  ;;  %s50_s28 = int_to_ptr.vmem [resolvable:$true] %s49_s28 }
  0x1b   :  { %s1286_s1 = scalar_lea.vmem %s26_s26, 256  ;;  %p1291_p11 = scmp.lt.s32.totalorder %s26_s26, %s26_s26 }
  0x1c   :  { %p1287_p10 = scmp.ne.s32.totalorder %s26_s26, %s1286_s1  ;;  %p1292_p12 = scmp.lt.s32.totalorder %s1286_s1, %s1286_s1 }
  0x1e   :  { %p1293_p13 = por %p1292_p12, %p1291_p11 }
  0x20   :  { %p1294_p0 = pnand %p1293_p13, %p1287_p10 }
  0x22   :  { %1297 = shalt.err (!%p1294_p0)
}
  0x23   :  { %31 = dma.hbm_to_vmem [thread:$0]  %s1517_s0, 256, %s26_s26, [#allocation5], %s1390_s18, %s1390_s18, %s1391_s19  }
  0x24   :  { %s1306_s4 = scalar_lea.vmem %s50_s28, 2048  ;;  %p1311_p2 = scmp.lt.s32.totalorder %s50_s28, %s50_s28 }
  0x25   :  { %p1307_p1 = scmp.ne.s32.totalorder %s50_s28, %s1306_s4  ;;  %p1312_p3 = scmp.lt.s32.totalorder %s1306_s4, %s1306_s4 }
  0x27   :  { %p1313_p4 = por %p1312_p3, %p1311_p2 }
  0x29   :  { %p1314_p5 = pnand %p1313_p4, %p1307_p1 }
  0x2b   :  { %1317 = shalt.err (!%p1314_p5)
}
  0x2c   :  { %55 = dma.hbm_to_vmem [thread:$0]  %s1519_s2, 2048, %s50_s28, [#allocation8], %s1390_s18, %s1390_s18, %s1391_s19  }
  0x2d   :  { %s1394_s13 = smov [#allocation12]   ;;  %s1395_s15 = smov [#allocation13]  }
  0x2e   :  { %s75_s14 = sshll.u32 %s1394_s13, 4  ;;  %s91_s16 = sshll.u32 %s1395_s15, 4  ;;  %s76_s14 = int_to_ptr.vmem [resolvable:$true] %s75_s14  ;;  %s92_s16 = int_to_ptr.vmem [resolvable:$true] %s91_s16 }
  0x2f   :  { %s1326_s0 = scalar_lea.vmem %s76_s14, 2048  ;;  %p1331_p7 = scmp.lt.s32.totalorder %s76_s14, %s76_s14 }
  0x30   :  { %p1327_p6 = scmp.ne.s32.totalorder %s76_s14, %s1326_s0  ;;  %p1332_p8 = scmp.lt.s32.totalorder %s1326_s0, %s1326_s0 }
  0x32   :  { %p1333_p9 = por %p1332_p8, %p1331_p7 }
  0x34   :  { %p1334_p10 = pnand %p1333_p9, %p1327_p6 }
  0x36   :  { %1337 = shalt.err (!%p1334_p10)
}
  0x37   :  { %81 = dma.hbm_to_vmem [thread:$0]  %s1522_s5, 2048, %s76_s14, [#allocation11], %s1390_s18, %s1390_s18, %s1391_s19  }
  0x38   :  { %s1346_s2 = scalar_lea.vmem %s92_s16, 2048  ;;  %p1351_p12 = scmp.lt.s32.totalorder %s92_s16, %s92_s16 }
  0x39   :  { %p1347_p11 = scmp.ne.s32.totalorder %s92_s16, %s1346_s2  ;;  %p1352_p13 = scmp.lt.s32.totalorder %s1346_s2, %s1346_s2 }
  0x3b   :  { %p1353_p0 = por %p1352_p13, %p1351_p12 }
  0x3d   :  { %p1354_p1 = pnand %p1353_p0, %p1347_p11 }
  0x3f   :  { %1357 = shalt.err (!%p1354_p1)
}
  0x40   :  { %97 = dma.hbm_to_vmem [thread:$0]  %s1525_s8, 2048, %s92_s16, [#allocation14], %s1390_s18, %s1390_s18, %s1391_s19  }
  0x41   :  { %1378 = dma.done.wait [#allocation5], 256  }
  0x42   :  { %1379 = vsyncadd [#allocation5], 4294967040 }
  0x43   :  { %1380 = dma.done.wait [#allocation8], 2304  }
  0x44   :  { %1381 = vsyncadd [#allocation8], 4294964992 }
  0x45   :  { %1382 = dma.done.wait [#allocation11], 2176  }
  0x46   :  { %1383 = vsyncadd [#allocation11], 4294965120 }
  0x47   :  { %1384 = dma.done.wait [#allocation14], 2048  }
  0x48   :  { %1385 = vsyncadd [#allocation14], 4294965248  ;;  %v1172_v0 = vld [vmem:[#allocation4 + $0x8] sm:$0xff]   ;;  %v1173_v1 = vld [vmem:[#allocation4] sm:$0xff]   ;;  %vm149_vm0 = vcmask 261120   ;;  %v1396_v26 = vmov 0.0  }
  0x49   :  { %1137 = vmatprep.subr.bf16.mxu1 %v1172_v0  ;;  %v1174_v2 = vld [vmem:[#allocation7] sm:$0xff]   ;;  %v1176_v3 = vld [vmem:[#allocation9 + $0x78] sm:$0xff]   ;;  %v1180_v8 = vld [vmem:[#allocation9 + $0x68] sm:$0xff]   ;;  %vm1397_vm1 = vmmov 0   ;;  %vm694_vm2 = vcmask 130048  }
  0x4a   :  { %1138 = vmatpush3.bf16.msra.mxu1 %v1172_v0  ;;  %1141 = vmatprep.mubr.msk.bf16.mxu1 %vm149_vm0, %v1174_v2  ;;  %v1175_v4 = vld [vmem:[#allocation7 + $0x8] sm:$0xff]   ;;  %v1178_v6 = vld [vmem:[#allocation9 + $0x70] sm:$0xff]   ;;  %v1181_v9 = vld [vmem:[#allocation9 + $0x28] sm:$0xff]  }
  0x4b   :  { %1139 = vmatprep.subr.bf16.mxu1 %v1173_v1  ;;  %v1177_v5 = vld [vmem:[#allocation9 + $0x38] sm:$0xff]   ;;  %v1179_v7 = vld [vmem:[#allocation9 + $0x30] sm:$0xff]   ;;  %v1182_v10 = vld [vmem:[#allocation9 + $0x60] sm:$0xff]  }
  0x4c   :  { %v1183_v11 = vld [vmem:[#allocation9 + $0x20] sm:$0xff]   ;;  %v1184_v12 = vld [vmem:[#allocation9 + $0x58] sm:$0xff]   ;;  %v1186_v14 = vld [vmem:[#allocation9 + $0x50] sm:$0xff]  }
  0x4d   :  { %v1185_v13 = vld [vmem:[#allocation9 + $0x18] sm:$0xff]   ;;  %v1187_v15 = vld [vmem:[#allocation9 + $0x10] sm:$0xff]   ;;  %v1188_v16 = vld [vmem:[#allocation9 + $0x48] sm:$0xff]  }
  0x4e   :  { %1140 = vmatpush3.bf16.msra.mxu1 %v1173_v1  ;;  %v1189_v17 = vld [vmem:[#allocation9 + $0x8] sm:$0xff]   ;;  %v1190_v18 = vld [vmem:[#allocation9 + $0x40] sm:$0xff]   ;;  %v1198_v29 = vld [vmem:[#allocation12 + $0x70] sm:$0xff]  }
  0x4f   :  { %1060 = vmatprep.subr.bf16.mxu1 %v1176_v3  ;;  %v1191_v19 = vld [vmem:[#allocation9] sm:$0xff]   ;;  %v1199_v30 = vld [vmem:[#allocation12 + $0x30] sm:$0xff]   ;;  %v1200_v31 = vld [vmem:[#allocation12 + $0x68] sm:$0xff]  }
  0x50   :  { %v1196_v27 = vld [vmem:[#allocation12 + $0x78] sm:$0xff]   ;;  %v1201_v32 = vld [vmem:[#allocation12 + $0x28] sm:$0xff]   ;;  %v1202_v33 = vld [vmem:[#allocation12 + $0x60] sm:$0xff]  }
  0x51   :  { %1142 = vmatmul.mubr.msk.bf16.vlgmr.msra.gmra.mxu1 %vm149_vm0, %v1175_v4  ;;  %v1197_v28 = vld [vmem:[#allocation12 + $0x38] sm:$0xff]   ;;  %1091 = vmatprep.subr.bf16.mxu0 %v1196_v27  ;;  %v1203_v34 = vld [vmem:[#allocation12 + $0x20] sm:$0xff]   ;;  %v1206_v37 = vld [vmem:[#allocation12 + $0x50] sm:$0xff]  }
  0x52   :  { %1061 = vmatpush3.bf16.msra.mxu1 %v1177_v5  ;;  %374 = vmatprep.mubr.bf16.mxu1 %v1173_v1  ;;  %v1204_v35 = vld [vmem:[#allocation12 + $0x58] sm:$0xff]   ;;  %v1207_v38 = vld [vmem:[#allocation12 + $0x10] sm:$0xff]   ;;  %v1208_v39 = vld [vmem:[#allocation12 + $0x48] sm:$0xff]  }
  0x53   :  { %1062 = vmatprep.subr.bf16.mxu1 %v1178_v6  ;;  %1092 = vmatpush3.bf16.msra.mxu0 %v1197_v28  ;;  %v1205_v36 = vld [vmem:[#allocation12 + $0x18] sm:$0xff]   ;;  %v969_v43 = vld [vmem:[%s1520_s3] ss:$0 sm:$0xff]  ;;  %v1209_v3 = vld [vmem:[#allocation12 + $0x8] sm:$0xff]  }
  0x54   :  { %1093 = vmatprep.subr.bf16.mxu0 %v1198_v29  ;;  %v1195_v2 = vld [vmem:[#allocation10] sm:$0xff]   ;;  %v1210_v4 = vld [vmem:[#allocation12 + $0x40] sm:$0xff]  }
  0x55   :  { %v1211_v5 = vld [vmem:[#allocation12] sm:$0xff]  }
  0x56   :  { %1063 = vmatpush3.bf16.msra.mxu1 %v1179_v7  ;;  %v995_v27 = vld [vmem:[%s1523_s6] ss:$0 sm:$0xff] }
  0x57   :  { %1064 = vmatprep.subr.bf16.mxu1 %v1180_v8  ;;  %1094 = vmatpush3.bf16.msra.mxu0 %v1199_v30 }
  0x58   :  { %1095 = vmatprep.subr.bf16.mxu0 %v1200_v31 }
  0x5a   :  { %1065 = vmatpush3.bf16.msra.mxu1 %v1181_v9 }
  0x5b   :  { %1066 = vmatprep.subr.bf16.mxu1 %v1182_v10  ;;  %1096 = vmatpush3.bf16.msra.mxu0 %v1201_v32 }
  0x5c   :  { %1097 = vmatprep.subr.bf16.mxu0 %v1202_v33 }
  0x5e   :  { %1067 = vmatpush3.bf16.msra.mxu1 %v1183_v11  ;;  %v1214_v11 = vld [vmem:[#allocation13 + $0x78] sm:$0xff]  }
  0x5f   :  { %1068 = vmatprep.subr.bf16.mxu1 %v1184_v12  ;;  %1098 = vmatpush3.bf16.msra.mxu0 %v1203_v34  ;;  %v1215_v12 = vld [vmem:[#allocation13 + $0x38] sm:$0xff]  }
  0x60   :  { %1099 = vmatprep.subr.bf16.mxu0 %v1204_v35 }
  0x62   :  { %1069 = vmatpush3.bf16.msra.mxu1 %v1185_v13  ;;  %v1216_v13 = vld [vmem:[#allocation13 + $0x70] sm:$0xff]  }
  0x63   :  { %1070 = vmatprep.subr.bf16.mxu1 %v1186_v14  ;;  %1100 = vmatpush3.bf16.msra.mxu0 %v1205_v36  ;;  %v1217_v14 = vld [vmem:[#allocation13 + $0x30] sm:$0xff]  }
  0x64   :  { %1101 = vmatprep.subr.bf16.mxu0 %v1206_v37  ;;  %v1213_v37 = vld [vmem:[%s1524_s7] sm:$0xff]  }
  0x66   :  { %1071 = vmatpush3.bf16.msra.mxu1 %v1187_v15  ;;  %v1218_v15 = vld [vmem:[#allocation13 + $0x68] sm:$0xff]  }
  0x67   :  { %1072 = vmatprep.subr.bf16.mxu1 %v1188_v16  ;;  %1102 = vmatpush3.bf16.msra.mxu0 %v1207_v38  ;;  %v1219_v16 = vld [vmem:[#allocation13 + $0x28] sm:$0xff]  }
  0x68   :  { %1103 = vmatprep.subr.bf16.mxu0 %v1208_v39  ;;  %v1227_v38 = vld [vmem:[#allocation13 + $0x8] sm:$0xff]   ;;  %v1228_v39 = vld [vmem:[#allocation13 + $0x40] sm:$0xff]  }
  0x6a   :  { %1073 = vmatpush3.bf16.msra.mxu1 %v1189_v17  ;;  %v1220_v17 = vld [vmem:[#allocation13 + $0x60] sm:$0xff]  }
  0x6b   :  { %1074 = vmatprep.subr.bf16.mxu1 %v1190_v18  ;;  %1104 = vmatpush3.bf16.msra.mxu0 %v1209_v3  ;;  %v1221_v18 = vld [vmem:[#allocation13 + $0x20] sm:$0xff]  }
  0x6c   :  { %1105 = vmatprep.subr.bf16.mxu0 %v1210_v4 }
  0x6e   :  { %1075 = vmatpush3.bf16.msra.mxu1 %v1191_v19  ;;  %v1222_v19 = vld [vmem:[#allocation13 + $0x58] sm:$0xff]  }
  0x6f   :  { %1145 = vmatprep.subr.bf16.mxu1 %v1396_v26  ;;  %1106 = vmatpush3.bf16.msra.mxu0 %v1211_v5 }
  0x70   :  { %1115 = vmatprep.subr.bf16.mxu0 %v1214_v11 }
 0x111   :  { %v1143_v20 = vpop.f32.mrf.mxu1 }
 0x113   :  { %v190_v21 = vpop.f32.mrf.mxu1 }
 0x115   :  { %v1144_v22 = vpop.f32.mrf.mxu1 }
 0x116   :  { %v206_v25 = vpack.c.bf16 %v1144_v22, %v1143_v20  ;;  %v1223_v20 = vld [vmem:[#allocation13 + $0x18] sm:$0xff]   ;;  %v1225_v22 = vld [vmem:[#allocation13 + $0x10] sm:$0xff]  }
 0x117   :  { %v193_v23 = vpop.f32.mrf.mxu1 }
 0x118   :  { %v205_v24 = vpack.c.bf16 %v193_v23, %v190_v21  ;;  %v1224_v21 = vld [vmem:[#allocation13 + $0x50] sm:$0xff]   ;;  %v1226_v23 = vld [vmem:[#allocation13 + $0x48] sm:$0xff]  }
 0x11a   :  { %375 = vmatmul.mubr.bf16.vlgmr.msra.gmra.mxu1 %v205_v24 }
 0x11b   :  { %382 = vmatprep.mubr.bf16.mxu1 %v1172_v0 }
 0x122   :  { %383 = vmatmul.mubr.bf16.gmra.mxu1 %v206_v25 }
 0x123   :  { %1149 = vmatprep.mubr.msk.bf16.mxu1 %vm1397_vm1, %v1396_v26 }
 0x1da   :  { %v1076_v40 = vpop.f32.mrf.mxu1 }
 0x1dc   :  { %v1077_v41 = vpop.f32.mrf.mxu1 }
 0x1dd   :  { %v1078_v42 = vadd.f32 %v1077_v41, %v1076_v40  ;;  %v1229_v40 = vld [vmem:[#allocation13] sm:$0xff]  }
 0x1de   :  { %v1079_v44 = vpop.f32.mrf.mxu1 }
 0x1df   :  { %v377_v46 = vadd.f32 %v1078_v42, %v969_v43 }
 0x1e0   :  { %v1080_v45 = vpop.f32.mrf.mxu1 }
 0x1e1   :  { %v1081_v47 = vadd.f32 %v1080_v45, %v1079_v44  ;;  %v391_v51 = vmax.f32 %v377_v46, 0.0  ;;  %v916_v46 = vlaneseq }
 0x1e2   :  { %v1082_v48 = vpop.f32.mrf.mxu1 }
 0x1e3   :  { %v380_v49 = vadd.f32 %v1081_v47, %v969_v43 }
 0x1e4   :  { %v1083_v50 = vpop.f32.mrf.mxu1 }
 0x1e5   :  { %v392_v52 = vmax.f32 %v380_v49, 0.0  ;;  %v1084_v53 = vadd.f32 %v1083_v50, %v1082_v48  ;;  %v917_v48 = vand.u32 127, %v916_v46  ;;  %v1017_v50 = vld [vmem:[%s1526_s9] ss:$0 sm:$0xff]  ;;  %s1398_s9 = smov [#allocation15]  }
 0x1e6   :  { %v1085_v54 = vpop.f32.mrf.mxu1  ;;  %s948_s24 = sshll.u32 %s1398_s9, 4  ;;  %s949_s24 = int_to_ptr.vmem [resolvable:$true] %s948_s24 }
 0x1e7   :  { %v1043_v55 = vpack.c.bf16 %v392_v52, %v391_v51  ;;  %v385_v57 = vadd.f32 %v1084_v53, %v969_v43  ;;  %vm918_vm3 = vcmp.lt.s32.totalorder %v917_v48, 8  ;;  %s1358_s25 = scalar_lea.vmem %s949_s24, 256  ;;  %p1363_p3 = scmp.lt.s32.totalorder %s949_s24, %s949_s24 }
 0x1e8   :  { %v1086_v56 = vpop.f32.mrf.mxu1  ;;  %p1359_p2 = scmp.ne.s32.totalorder %s949_s24, %s1358_s25  ;;  %p1364_p4 = scmp.lt.s32.totalorder %s1358_s25, %s1358_s25 }
 0x1e9   :  { %1044 = vst [vmem:[#allocation2] sm:$0xff] %v1043_v55   ;;  %v1087_v58 = vadd.f32 %v1086_v56, %v1085_v54  ;;  %v393_v60 = vmax.f32 %v385_v57, 0.0 }
 0x1ea   :  { %p1365_p5 = por %p1364_p4, %p1363_p3 }
 0x1eb   :  { %v388_v59 = vadd.f32 %v1087_v58, %v969_v43 }
 0x1ec   :  { %p1366_p6 = pnand %p1365_p5, %p1359_p2 }
 0x1ed   :  { %v394_v61 = vmax.f32 %v388_v59, 0.0 }
 0x1ef   :  { %v1048_v62 = vpack.c.bf16 %v394_v61, %v393_v60 }
 0x1f0   :  { %v1192_v63 = vld [vmem:[#allocation2] sm:$0xff]  }
 0x1f1   :  { %1055 = vst [vmem:[#allocation2 + $0x8] sm:$0xff] %v1048_v62   ;;  %658 = vmatprep.mubr.bf16.mxu0 %v1192_v63  ;;  %v1194_v1 = vld [vmem:[#allocation2] sm:$0xff]  }
 0x1f8   :  { %v1193_v0 = vld [vmem:[#allocation2 + $0x8] sm:$0xff]  }
 0x1f9   :  { %1146 = vmatpush3.bf16.msra.mxu1 %v1193_v0 }
 0x1fa   :  { %1147 = vmatprep.subr.bf16.mxu1 %v1396_v26 }
 0x1fd   :  { %1148 = vmatpush3.bf16.msra.mxu1 %v1194_v1 }
 0x1fe   :  { %1153 = vmatprep.subr.bf16.mxu1 %v1396_v26 }
 0x200   :  { %1150 = vmatmul.mubr.msk.bf16.vlgmr.msra.gmra.mxu1 %vm149_vm0, %v1195_v2 }
 0x201   :  { %1155 = vmatprep.mubr.msk.bf16.mxu1 %vm1397_vm1, %v1396_v26 }
 0x2c0   :  { %v475_v6 = vpop.f32.mrf.mxu1 }
 0x2c2   :  { %v1151_v7 = vpop.f32.mrf.mxu1 }
 0x2c4   :  { %v478_v8 = vpop.f32.mrf.mxu1 }
 0x2c5   :  { %v484_v9 = vpack.c.bf16 %v478_v8, %v475_v6 }
 0x2c6   :  { %v1152_v10 = vpop.f32.mrf.mxu1 }
 0x2c7   :  { %659 = vmatmul.mubr.bf16.vlgmr.msra.gmra.mxu0 %v484_v9 }
 0x2c8   :  { %1116 = vmatpush3.bf16.msra.mxu0 %v1215_v12 }
 0x2c9   :  { %1117 = vmatprep.subr.bf16.mxu0 %v1216_v13 }
 0x2cc   :  { %1118 = vmatpush3.bf16.msra.mxu0 %v1217_v14 }
 0x2cd   :  { %1119 = vmatprep.subr.bf16.mxu0 %v1218_v15 }
 0x2d0   :  { %1120 = vmatpush3.bf16.msra.mxu0 %v1219_v16 }
 0x2d1   :  { %1121 = vmatprep.subr.bf16.mxu0 %v1220_v17 }
 0x2d4   :  { %1122 = vmatpush3.bf16.msra.mxu0 %v1221_v18 }
 0x2d5   :  { %1123 = vmatprep.subr.bf16.mxu0 %v1222_v19 }
 0x2d8   :  { %1124 = vmatpush3.bf16.msra.mxu0 %v1223_v20 }
 0x2d9   :  { %1125 = vmatprep.subr.bf16.mxu0 %v1224_v21 }
 0x2dc   :  { %1126 = vmatpush3.bf16.msra.mxu0 %v1225_v22 }
 0x2dd   :  { %1127 = vmatprep.subr.bf16.mxu0 %v1226_v23 }
 0x2e0   :  { %1128 = vmatpush3.bf16.msra.mxu0 %v1227_v38 }
 0x2e1   :  { %1129 = vmatprep.subr.bf16.mxu0 %v1228_v39 }
 0x2e4   :  { %1130 = vmatpush3.bf16.msra.mxu0 %v1229_v40 }
 0x387   :  { %v1107_v24 = vpop.f32.mrf.mxu0 }
 0x389   :  { %v1108_v25 = vpop.f32.mrf.mxu0 }
 0x38a   :  { %v1109_v26 = vadd.f32 %v1108_v25, %v1107_v24 }
 0x38b   :  { %v1110_v28 = vpop.f32.mrf.mxu0 }
 0x38c   :  { %v661_v30 = vadd.f32 %v1109_v26, %v995_v27 }
 0x38d   :  { %v1111_v29 = vpop.f32.mrf.mxu0 }
 0x38e   :  { %v1112_v31 = vadd.f32 %v1111_v29, %v1110_v28  ;;  %v667_v33 = vmax.f32 %v661_v30, 0.0 }
 0x390   :  { %v664_v32 = vadd.f32 %v1112_v31, %v995_v27 }
 0x392   :  { %v668_v34 = vmax.f32 %v664_v32, 0.0 }
 0x394   :  { %v1053_v35 = vpack.c.bf16 %v668_v34, %v667_v33 }
 0x396   :  { %1054 = vst [vmem:[#allocation3] sm:$0xff] %v1053_v35  }
 0x39d   :  { %v1212_v36 = vld [vmem:[#allocation3] sm:$0xff]  }
 0x39e   :  { %1154 = vmatpush3.bf16.msra.mxu1 %v1212_v36  ;;  %907 = vmatprep.mubr.bf16.mxu0 %v1212_v36 }
 0x3a1   :  { %1156 = vmatmul.mubr.msk.bf16.vlgmr.msra.gmra.mxu1 %vm694_vm2, %v1213_v37 }
 0x461   :  { %v732_v41 = vpop.f32.mrf.mxu1 }
 0x463   :  { %v1157_v42 = vpop.f32.mrf.mxu1 }
 0x465   :  { %v735_v43 = vpop.f32.mrf.mxu1 }
 0x466   :  { %v739_v44 = vpack.c.bf16 %v735_v43, %v732_v41 }
 0x467   :  { %v1158_v45 = vpop.f32.mrf.mxu1 }
 0x468   :  { %908 = vmatmul.mubr.bf16.vlgmr.msra.gmra.mxu0 %v739_v44 }
 0x528   :  { %v1131_v47 = vpop.f32.mrf.mxu0 }
 0x52a   :  { %v1132_v49 = vpop.f32.mrf.mxu0 }
 0x52b   :  { %v1133_v51 = vadd.f32 %v1132_v49, %v1131_v47 }
 0x52c   :  { %v1134_v52 = vpop.f32.mrf.mxu0 }
 0x52d   :  { %v910_v53 = vadd.f32 %v1133_v51, %v1017_v50 }
 0x52e   :  { %v1135_v54 = vpop.f32.mrf.mxu0 }
 0x52f   :  { %v1136_v55 = vadd.f32 %v1135_v54, %v1134_v52  ;;  %v919_v56 = vsel %vm918_vm3, %v910_v53, -1e+30 }
 0x530   :  { %921 = vmax.xlane.f32.xlu0 %v919_v56 }
 0x531   :  { %v913_v57 = vadd.f32 %v1136_v55, %v1017_v50 }
 0x533   :  { %v920_v58 = vsel %vm918_vm3, %v913_v57, -1e+30 }
 0x534   :  { %923 = vmax.xlane.f32.xlu0 %v920_v58 }
 0x5b9   :  { %v922_v59 = vpop.xlane.xlu0 %921 }
 0x5ba   :  { %v925_v60 = vsub.f32 %v919_v56, %v922_v59 }
 0x5bc   :  { %v927_v61 = vmul.f32 1.442695, %v925_v60 }
 0x5bd   :  { %v924_v62 = vpop.xlane.xlu0 %923 }
 0x5be   :  { %v926_v63 = vsub.f32 %v920_v58, %v924_v62  ;;  %1230 = vpow2.f32 %v927_v61 }
 0x5c0   :  { %v929_v0 = vmul.f32 1.442695, %v926_v63 }
 0x5c2   :  { %1232 = vpow2.f32 %v929_v0 }
 0x5cb   :  { %v1231_v1 = vpop.eup %1230 }
 0x5cc   :  { %931 = vadd.xlane.f32.xlu1 %v1231_v1 }
 0x5cf   :  { %v1233_v2 = vpop.eup %1232 }
 0x5d0   :  { %933 = vadd.xlane.f32.xlu1 %v1233_v2 }
 0x655   :  { %v932_v3 = vpop.xlane.xlu1 %931 }
 0x656   :  { %1234 = vlog2.f32 %v932_v3 }
 0x659   :  { %v934_v4 = vpop.xlane.xlu1 %933 }
 0x65a   :  { %1236 = vlog2.f32 %v934_v4 }
 0x663   :  { %v1235_v5 = vpop.eup %1234 }
 0x664   :  { %v936_v6 = vmul.f32 0.6931472, %v1235_v5 }
 0x666   :  { %v939_v7 = vsub.f32 %v925_v60, %v936_v6 }
 0x667   :  { %v1237_v8 = vpop.eup %1236 }
 0x668   :  { %941 = vst [vmem:[#allocation15] sm:$0xff] %v939_v7  ;;  %v938_v9 = vmul.f32 0.6931472, %v1237_v8 }
 0x66a   :  { %v940_v10 = vsub.f32 %v926_v63, %v938_v9 }
 0x66c   :  { %942 = vst [vmem:[#allocation15 + $0x8] sm:$0xff] %v940_v10 }
 0x66d   :  { %1369 = shalt.err (!%p1366_p6)
}
 0x66e   :  { %s1399_s26 = smov 128   ;;  %s1400_s27 = smov 8  }
 0x66f   :  { %954 = dma.vmem_to_hbm [thread:$0]  %s949_s24, 256, %s1527_s10, [#allocation6], %s1399_s26, %s1399_s26, %s1400_s27  }
 0x670   :  { %1386 = dma.done.wait [#allocation6], 256  }
 0x671   :  { %1387 = vsyncadd [#allocation6], 4294967040 }
 0x672   :  { %958 = vsyncpa [#allocation5], 1 }
 0x673   :  { %959 = vsyncpa [#allocation8], 1 }
 0x674   :  { %960 = vsyncpa [#allocation11], 1 }
 0x675   :  { %961 = vsyncpa [#allocation14], 1 }
 0x676   :  { %962 = vsyncpa [#allocation6], 1 }

</bundles_post_ra>
